<compile_context>
chip_gen: v7x
topology: tpu7x:2x2x1
jax: 0.10.0
libtpu: 0.0.40
codegen_flags: <defaults>
</compile_context>

<pallas_src>
import functools
import math

import jax
import jax.numpy as jnp
from jax.experimental import pallas as pl
from jax.experimental.pallas import tpu as pltpu


_VMEM_LIMIT = 32 * 1024 * 1024  # leaves headroom on v7x (64 MiB/TC); fine on v5e/v6e


# ----------------------------------------------------------------------------
# small helpers
# ----------------------------------------------------------------------------
def _choose_tm(M, target):
    # Big M tile (multiple of 8) when M is large, else the full M (block == full dim is
    # always legal).  Tail blocks are masked by Pallas via pl.cdiv -> no pad/slice.
    return target if M >= target else M


def _choose_tn(K, N, max_weight_bytes=16 * 1024 * 1024):
    # Keep the whole (K, N) bf16 weight resident when it fits (true for standard BERT);
    # otherwise tile N (N is the OUTER grid axis, so each weight tile loads only once).
    if K * N * 2 <= max_weight_bytes:
        return N
    for tn in (4096, 2048, 1024, 512, 256, 128):
        if N % tn == 0 and K * tn * 2 <= max_weight_bytes:
            return tn
    return N


def _heads_per_group(n_heads, dh):
    # Smallest head-group whose lane width is a multiple of 128 (2 heads x 64 for
    # BERT-base); fallback: all heads in one group (group width == hidden, still legal).
    for g in range(1, n_heads + 1):
        if n_heads % g == 0 and (g * dh) % 128 == 0:
            return g
    return n_heads


# ----------------------------------------------------------------------------
# Pallas kernels
# ----------------------------------------------------------------------------
def _dense_kernel(x_ref, w_ref, b_ref, o_ref, *, act):
    # x: (tm, K) bf16, w: (K, tn) bf16, b: (1, tn) f32 -> o: (tm, tn) bf16
    y = jnp.dot(x_ref[...], w_ref[...], preferred_element_type=jnp.float32)
    y = y + b_ref[...]
    if act == "gelu":
        # tanh-approx GELU: transcendental goes to the EUP slot, VALU stays free.
        y = 0.5 * y * (1.0 + jnp.tanh(0.7978845608028654 * (y + 0.044715 * y * y * y)))
    elif act == "tanh":
        y = jnp.tanh(y)
    o_ref[...] = y.astype(o_ref.dtype)


def dense(x2d, w, b, act="none", tm_target=512):
    """y = act(x @ w + b).  Grid (N tiles OUTER, M tiles inner): weight stays resident
    across the whole M sweep, so each weight tile is fetched from HBM exactly once."""
    M, K = x2d.shape
    N = w.shape[1]
    tm = _choose_tm(M, tm_target)
    tn = _choose_tn(K, N)
    b2 = b.reshape(1, N).astype(jnp.float32)
    return pl.pallas_call(
        functools.partial(_dense_kernel, act=act),
        out_shape=jax.ShapeDtypeStruct((M, N), x2d.dtype),
        grid_spec=pltpu.PrefetchScalarGridSpec(
            num_scalar_prefetch=0,
            grid=(N // tn, pl.cdiv(M, tm)),          # j (N) outer, i (M) inner
            in_specs=[
                pl.BlockSpec((tm, K), lambda j, i: (i, 0)),
                pl.BlockSpec((K, tn), lambda j, i: (0, j)),
                pl.BlockSpec((1, tn), lambda j, i: (0, j)),
            ],
            out_specs=pl.BlockSpec((tm, tn), lambda j, i: (i, j)),
        ),
        compiler_params=pltpu.CompilerParams(
            dimension_semantics=("parallel", "parallel"),
            vmem_limit_bytes=_VMEM_LIMIT),
    )(x2d, w, b2)


def _dense_add_ln_kernel(x_ref, w_ref, b_ref, r_ref, g_ref, bt_ref, o_ref, *, eps):
    # Fused: y = x @ w + b ; h = y + residual ; out = LayerNorm(h) * gamma + beta
    y = jnp.dot(x_ref[...], w_ref[...], preferred_element_type=jnp.float32)
    h = y + b_ref[...] + r_ref[...].astype(jnp.float32)
    # one-pass stats: var = E[h^2] - mean^2 (halves the cross-lane reductions)
    mean = jnp.mean(h, axis=-1, keepdims=True)
    var = jnp.maximum(jnp.mean(h * h, axis=-1, keepdims=True) - mean * mean, 0.0)
    norm = (h - mean) * jax.lax.rsqrt(var + eps)
    o_ref[...] = (norm * g_ref[...] + bt_ref[...]).astype(o_ref.dtype)


def dense_add_layernorm(x2d, w, b, res2d, gamma, beta, eps=1e-12, tm_target=512):
    """LayerNorm((x @ w + b) + residual) fused into the projection's epilogue."""
    M, K = x2d.shape
    H = w.shape[1]
    tm = _choose_tm(M, tm_target)
    b2 = b.reshape(1, H).astype(jnp.float32)
    g2 = gamma.reshape(1, H).astype(jnp.float32)
    bt2 = beta.reshape(1, H).astype(jnp.float32)
    return pl.pallas_call(
        functools.partial(_dense_add_ln_kernel, eps=eps),
        out_shape=jax.ShapeDtypeStruct((M, H), res2d.dtype),
        grid_spec=pltpu.PrefetchScalarGridSpec(
            num_scalar_prefetch=0,
            grid=(pl.cdiv(M, tm),),
            in_specs=[
                pl.BlockSpec((tm, K), lambda i: (i, 0)),
                pl.BlockSpec((K, H), lambda i: (0, 0)),
                pl.BlockSpec((1, H), lambda i: (0, 0)),
                pl.BlockSpec((tm, H), lambda i: (i, 0)),
                pl.BlockSpec((1, H), lambda i: (0, 0)),
                pl.BlockSpec((1, H), lambda i: (0, 0)),
            ],
            out_specs=pl.BlockSpec((tm, H), lambda i: (i, 0)),
        ),
        compiler_params=pltpu.CompilerParams(
            dimension_semantics=("parallel",),
            vmem_limit_bytes=_VMEM_LIMIT),
    )(x2d, w, b2, res2d, g2, bt2)


def _layernorm_kernel(x_ref, g_ref, b_ref, o_ref, *, eps):
    h = x_ref[...].astype(jnp.float32)
    mean = jnp.mean(h, axis=-1, keepdims=True)
    var = jnp.maximum(jnp.mean(h * h, axis=-1, keepdims=True) - mean * mean, 0.0)
    norm = (h - mean) * jax.lax.rsqrt(var + eps)
    o_ref[...] = (norm * g_ref[...] + b_ref[...]).astype(o_ref.dtype)


def layernorm(x2d, gamma, beta, eps=1e-12, out_dtype=jnp.bfloat16, tm_target=512):
    """Residual-free LayerNorm (embedding output) — mem-bound, big tiles."""
    M, H = x2d.shape
    tm = _choose_tm(M, tm_target)
    g2 = gamma.reshape(1, H).astype(jnp.float32)
    b2 = beta.reshape(1, H).astype(jnp.float32)
    return pl.pallas_call(
        functools.partial(_layernorm_kernel, eps=eps),
        out_shape=jax.ShapeDtypeStruct((M, H), out_dtype),
        grid_spec=pltpu.PrefetchScalarGridSpec(
            num_scalar_prefetch=0,
            grid=(pl.cdiv(M, tm),),
            in_specs=[
                pl.BlockSpec((tm, H), lambda i: (i, 0)),
                pl.BlockSpec((1, H), lambda i: (0, 0)),
                pl.BlockSpec((1, H), lambda i: (0, 0)),
            ],
            out_specs=pl.BlockSpec((tm, H), lambda i: (i, 0)),
        ),
        compiler_params=pltpu.CompilerParams(
            dimension_semantics=("parallel",),
            vmem_limit_bytes=_VMEM_LIMIT),
    )(x2d, g2, b2)


def _attention_kernel(qkv_ref, m_ref, o_ref, *, heads_per_group, scale):
    # qkv_ref: (1, S, 3*gw) bf16 — one head-group's packed [Q_g | K_g | V_g]
    # m_ref:   (1, 1, S) f32 additive mask bias
    # o_ref:   (1, S, gw) bf16 — this group's lane-dense context slice of (B, S, H)
    S = qkv_ref.shape[1]
    gw = qkv_ref.shape[2] // 3
    dh = gw // heads_per_group
    qkv = qkv_ref[0]                       # (S, 3*gw)
    bias = m_ref[0]                        # (1, S), broadcasts over query rows
    q = qkv[:, 0 * gw:1 * gw]
    k = qkv[:, 1 * gw:2 * gw]
    v = qkv[:, 2 * gw:3 * gw]
    for j in range(heads_per_group):       # few heads per group; ctx stored immediately
        q_h = q[:, j * dh:(j + 1) * dh]
        k_h = k[:, j * dh:(j + 1) * dh]
        v_h = v[:, j * dh:(j + 1) * dh]
        s = jax.lax.dot_general(q_h, k_h, (((1,), (1,)), ((), ())),
                                preferred_element_type=jnp.float32)
        s = s * scale + bias
        mx = jnp.max(s, axis=-1, keepdims=True)
        p = jnp.exp(s - mx)
        denom = jnp.sum(p, axis=-1, keepdims=True)
        p = p * pl.reciprocal(denom, approx=True)      # EUP slot, frees the VPU
        ctx = jnp.dot(p.astype(v_h.dtype), v_h, preferred_element_type=jnp.float32)
        o_ref[0, :, j * dh:(j + 1) * dh] = ctx.astype(o_ref.dtype)
    # no concatenate: at most one (S, S) f32 score matrix is live at any time.


def attention(qkv3, mask_bias, n_heads, scale):
    # qkv3: (B, S, 3H) bf16 in GROUP-major layout; mask_bias: (B, 1, S) f32 (0 / -1e4)
    B, S, H3 = qkv3.shape
    H = H3 // 3
    dh = H // n_heads
    hg = _heads_per_group(n_heads, dh)
    gw = hg * dh
    n_groups = n_heads // hg
    return pl.pallas_call(
        functools.partial(_attention_kernel, heads_per_group=hg, scale=scale),
        out_shape=jax.ShapeDtypeStruct((B, S, H), qkv3.dtype),
        grid_spec=pltpu.PrefetchScalarGridSpec(
            num_scalar_prefetch=0,
            grid=(B, n_groups),                        # 2 parallel axes -> both v7x TCs
            in_specs=[
                pl.BlockSpec((1, S, 3 * gw), lambda b, g: (b, 0, g)),
                pl.BlockSpec((1, 1, S), lambda b, g: (b, 0, 0)),
            ],
            out_specs=pl.BlockSpec((1, S, gw), lambda b, g: (b, 0, g)),
        ),
        compiler_params=pltpu.CompilerParams(
            dimension_semantics=("parallel", "parallel"),
            vmem_limit_bytes=_VMEM_LIMIT),
    )(qkv3, mask_bias)


# ----------------------------------------------------------------------------
# Parameter construction (deterministic, matching _init_weights semantics)
# ----------------------------------------------------------------------------
def init_params(key, *, vocab_size, hidden, n_layers, n_heads, intermediate,
                max_pos, type_vocab, pad_token_id, std=0.02):
    dh = hidden // n_heads
    hg = _heads_per_group(n_heads, dh)
    gw = hg * dh
    n_groups = n_heads // hg

    def normal(k, shape):
        return std * jax.random.normal(k, shape, dtype=jnp.float32)

    keys = iter(jax.random.split(key, 16 + 8 * n_layers))
    p = {}
    we = normal(next(keys), (vocab_size, hidden))
    we = we.at[pad_token_id].set(0.0)                    # padding_idx zeroed
    p["word_emb"] = we
    p["pos_emb"] = normal(next(keys), (max_pos, hidden))
    p["type_emb"] = normal(next(keys), (type_vocab, hidden))
    p["emb_ln_g"] = jnp.ones((hidden,), jnp.float32)
    p["emb_ln_b"] = jnp.zeros((hidden,), jnp.float32)

    layers = []
    for _ in range(n_layers):
        wq = normal(next(keys), (hidden, hidden))
        wk = normal(next(keys), (hidden, hidden))
        wv = normal(next(keys), (hidden, hidden))
        # GROUP-major packed QKV weight: [Q_g0|K_g0|V_g0 | Q_g1|K_g1|V_g1 | ...]
        cols = []
        for g in range(n_groups):
            sl = slice(g * gw, (g + 1) * gw)
            cols += [wq[:, sl], wk[:, sl], wv[:, sl]]
        w_qkv = jnp.concatenate(cols, axis=1).astype(jnp.bfloat16)
        lp = {
            "w_qkv": w_qkv,
            # Linear biases are zero-initialised, so the packed-bias layout is moot; if
            # loading pretrained weights, permute b_qkv with the same group-major order.
            "b_qkv": jnp.zeros((3 * hidden,), jnp.float32),
            "wo": normal(next(keys), (hidden, hidden)).astype(jnp.bfloat16),
            "bo": jnp.zeros((hidden,), jnp.float32),
            "ln1_g": jnp.ones((hidden,), jnp.float32),
            "ln1_b": jnp.zeros((hidden,), jnp.float32),
            "wi": normal(next(keys), (hidden, intermediate)).astype(jnp.bfloat16),
            "bi": jnp.zeros((intermediate,), jnp.float32),
            "wo2": normal(next(keys), (intermediate, hidden)).astype(jnp.bfloat16),
            "bo2": jnp.zeros((hidden,), jnp.float32),
            "ln2_g": jnp.ones((hidden,), jnp.float32),
            "ln2_b": jnp.zeros((hidden,), jnp.float32),
        }
        layers.append(lp)
    p["layers"] = layers

    # BertPooler params exist in the module but forward() never uses them.
    p["pooler_w"] = normal(next(keys), (hidden, hidden)).astype(jnp.bfloat16)
    p["pooler_b"] = jnp.zeros((hidden,), jnp.float32)
    return p


# ----------------------------------------------------------------------------
# Forward pass (gathers / reshapes in JAX glue, hot paths in Pallas)
# ----------------------------------------------------------------------------
def bert_forward(params, input_ids, attention_mask=None, token_type_ids=None,
                 position_ids=None, *, n_heads, layer_norm_eps=1e-12):
    B, S = input_ids.shape
    H = params["word_emb"].shape[1]
    dh = H // n_heads
    M = B * S

    if attention_mask is None:
        attention_mask = jnp.ones((B, S), jnp.float32)
    if token_type_ids is None:
        token_type_ids = jnp.zeros((B, S), jnp.int32)
    if position_ids is None:
        position_ids = jnp.broadcast_to(jnp.arange(S, dtype=jnp.int32), (B, S))

    # --- BERTEmbeddings: gathers (glue) + residual-free LayerNorm (Pallas) ---
    emb = (jnp.take(params["word_emb"], input_ids, axis=0)
           + jnp.take(params["pos_emb"], position_ids, axis=0)
           + jnp.take(params["type_emb"], token_type_ids, axis=0))
    x2 = layernorm(emb.reshape(M, H), params["emb_ln_g"], params["emb_ln_b"],
                   eps=layer_norm_eps, out_dtype=jnp.bfloat16)       # (M, H) bf16

    # additive attention mask bias: (B, 1, S)
    mask_bias = ((1.0 - attention_mask.astype(jnp.float32)) * -1e4).reshape(B, 1, S)
    scale = 1.0 / math.sqrt(dh)

    # --- XformerEncoder: num_hidden_layers standard BERT layers ---
    for lp in params["layers"]:
        # fused (group-major) QKV projection: one matmul, one kernel launch
        qkv2 = dense(x2, lp["w_qkv"], lp["b_qkv"])                   # (M, 3H) bf16
        qkv3 = qkv2.reshape(B, S, 3 * H)                             # metadata-only

        ctx = attention(qkv3, mask_bias, n_heads, scale)             # (B, S, H) bf16
        ctx2 = ctx.reshape(M, H)

        # attention output projection fused with residual add + LayerNorm
        x2 = dense_add_layernorm(ctx2, lp["wo"], lp["bo"], x2,
                                 lp["ln1_g"], lp["ln1_b"], eps=layer_norm_eps)

        # FFN: GELU up-proj, then down-proj fused with residual add + LayerNorm
        inter = dense(x2, lp["wi"], lp["bi"], act="gelu")            # (M, I) bf16
        x2 = dense_add_layernorm(inter, lp["wo2"], lp["bo2"], x2,
                                 lp["ln2_g"], lp["ln2_b"], eps=layer_norm_eps)

    encoder_outputs = x2.astype(jnp.float32).reshape(B, S, H)
    return {"encoder_outputs": encoder_outputs}


# ----------------------------------------------------------------------------
if __name__ == "__main__":
    # Small, BERT-consistent shapes.
    B, S = 2, 8
    H, N_HEADS, N_LAYERS, INTER = 32, 4, 2, 64
    VOCAB, MAX_POS, TYPE_VOCAB, PAD_ID = 100, 64, 2, 0

    root = jax.random.PRNGKey(0)
    k_param, k_ids = jax.random.split(root)

    params = init_params(
        k_param, vocab_size=VOCAB, hidden=H, n_layers=N_LAYERS, n_heads=N_HEADS,
        intermediate=INTER, max_pos=MAX_POS, type_vocab=TYPE_VOCAB,
        pad_token_id=PAD_ID)

    input_ids = jax.random.randint(k_ids, (B, S), 1, VOCAB, dtype=jnp.int32)

    out = bert_forward(params, input_ids, n_heads=N_HEADS)
    jax.block_until_ready(out["encoder_outputs"])
    assert out["encoder_outputs"].shape == (B, S, H)
    assert bool(jnp.all(jnp.isfinite(out["encoder_outputs"])))
    print("KERNEL_OK")
</pallas_src>

<mosaic_0001>
module attributes {stable_mosaic.version = 11 : i64} {
  func.func @_layernorm_kernel(%arg0: i32, %arg1: memref<16x32xf32, #tpu.memory_space<vmem>>, %arg2: memref<1x32xf32, #tpu.memory_space<vmem>>, %arg3: memref<1x32xf32, #tpu.memory_space<vmem>>, %arg4: memref<16x32xbf16, #tpu.memory_space<vmem>>) attributes {dimension_semantics = [#tpu.dimension_semantics<parallel>], iteration_bounds = array<i64: 1>, scalar_prefetch = 0 : i64, scratch_operands = 0 : i64, tpu.core_type = #tpu.core_type<tc>, window_params = [{transform_indices = @transform_0, window_bounds = array<i64: 16, 32>}, {pipeline_mode = #tpu.pipeline_mode<synchronous>, transform_indices = @transform_1, window_bounds = array<i64: 1, 32>}, {pipeline_mode = #tpu.pipeline_mode<synchronous>, transform_indices = @transform_2, window_bounds = array<i64: 1, 32>}, {transform_indices = @transform_3, window_bounds = array<i64: 16, 32>}]} {
    %c0 = arith.constant 0 : index
    %c0_0 = arith.constant 0 : index
    %0 = vector.load %arg1[%c0, %c0_0] : memref<16x32xf32, #tpu.memory_space<vmem>>, vector<16x32xf32>
    %cst = arith.constant dense<0.000000e+00> : vector<16xf32>
    %1 = vector.multi_reduction <add>, %0, %cst [1] : vector<16x32xf32> to vector<16xf32>
    %2 = vector.shape_cast %1 : vector<16xf32> to vector<16x1xf32>
    %cst_1 = arith.constant 3.200000e+01 : f32
    %3 = vector.broadcast %cst_1 : f32 to vector<16x1xf32>
    %4 = arith.divf %2, %3 : vector<16x1xf32>
    %5 = arith.mulf %0, %0 : vector<16x32xf32>
    %cst_2 = arith.constant dense<0.000000e+00> : vector<16xf32>
    %6 = vector.multi_reduction <add>, %5, %cst_2 [1] : vector<16x32xf32> to vector<16xf32>
    %7 = vector.shape_cast %6 : vector<16xf32> to vector<16x1xf32>
    %cst_3 = arith.constant 3.200000e+01 : f32
    %8 = vector.broadcast %cst_3 : f32 to vector<16x1xf32>
    %9 = arith.divf %7, %8 : vector<16x1xf32>
    %10 = arith.mulf %4, %4 : vector<16x1xf32>
    %11 = arith.subf %9, %10 : vector<16x1xf32>
    %cst_4 = arith.constant 0.000000e+00 : f32
    %12 = vector.broadcast %cst_4 : f32 to vector<16x1xf32>
    %13 = arith.maximumf %11, %12 : vector<16x1xf32>
    %14 = vector.broadcast %4 : vector<16x1xf32> to vector<16x32xf32>
    %15 = arith.subf %0, %14 : vector<16x32xf32>
    %cst_5 = arith.constant 9.99999996E-13 : f32
    %16 = vector.broadcast %cst_5 : f32 to vector<16x1xf32>
    %17 = arith.addf %13, %16 : vector<16x1xf32>
    %18 = math.rsqrt %17 : vector<16x1xf32>
    %19 = vector.broadcast %18 : vector<16x1xf32> to vector<16x32xf32>
    %20 = arith.mulf %15, %19 : vector<16x32xf32>
    %c0_6 = arith.constant 0 : index
    %c0_7 = arith.constant 0 : index
    %21 = vector.load %arg2[%c0_6, %c0_7] : memref<1x32xf32, #tpu.memory_space<vmem>>, vector<1x32xf32>
    %22 = vector.broadcast %21 : vector<1x32xf32> to vector<16x32xf32>
    %23 = arith.mulf %20, %22 : vector<16x32xf32>
    %c0_8 = arith.constant 0 : index
    %c0_9 = arith.constant 0 : index
    %24 = vector.load %arg3[%c0_8, %c0_9] : memref<1x32xf32, #tpu.memory_space<vmem>>, vector<1x32xf32>
    %25 = vector.broadcast %24 : vector<1x32xf32> to vector<16x32xf32>
    %26 = arith.addf %23, %25 : vector<16x32xf32>
    %27 = arith.truncf %26 : vector<16x32xf32> to vector<16x32xbf16>
    %c0_10 = arith.constant 0 : index
    %c0_11 = arith.constant 0 : index
    %28 = vector.load %arg4[%c0_10, %c0_11] : memref<16x32xbf16, #tpu.memory_space<vmem>>, vector<16x32xbf16>
    tpu.vector_store %arg4[%c0_10, %c0_11], %27 {strides = array<i32>} : memref<16x32xbf16, #tpu.memory_space<vmem>>, vector<16x32xbf16>,
    return
  }
  func.func @transform_0(%arg0: i32) -> (i32, i32) {
    %c0_i32 = arith.constant 0 : i32
    %c0_i32_0 = arith.constant 0 : i32
    return %arg0, %c0_i32 : i32, i32
  }
  func.func @transform_1(%arg0: i32) -> (i32, i32) {
    %c0_i32 = arith.constant 0 : i32
    %c0_i32_0 = arith.constant 0 : i32
    %c0_i32_1 = arith.constant 0 : i32
    return %c0_i32, %c0_i32_0 : i32, i32
  }
  func.func @transform_2(%arg0: i32) -> (i32, i32) {
    %c0_i32 = arith.constant 0 : i32
    %c0_i32_0 = arith.constant 0 : i32
    %c0_i32_1 = arith.constant 0 : i32
    return %c0_i32, %c0_i32_0 : i32, i32
  }
  func.func @transform_3(%arg0: i32) -> (i32, i32) {
    %c0_i32 = arith.constant 0 : i32
    %c0_i32_0 = arith.constant 0 : i32
    return %arg0, %c0_i32 : i32, i32
  }
}

</mosaic_0001>

<bundles_post_ra>
// kernel: tpu_custom_call.1
= control target key start
LH: loop header
LB: loop body
LE: loop exit
PB: predicated region body
PF: predicated region fallthrough
CT: control target
= control target key end

     0   :  { %8 = vsyncpa [#allocation3], 0  ;;  %s231_s0 = inlined_call_operand.hbm [shape: f32[16,32], index: 0, kind: input, shape index: {}]   ;;  %s232_s1 = inlined_call_operand.vmem [shape: f32[1,32], index: 1, kind: input, shape index: {}]   ;;  %s233_s2 = inlined_call_operand.vmem [shape: f32[1,32], index: 2, kind: input, shape index: {}]   ;;  %s234_s3 = inlined_call_operand.hbm [shape: bf16[16,32], index: 3, kind: output, shape index: {}]  }
   0x1   :  { %9 = vsyncpa [#allocation4], 0  ;;  %s175_s12 = smov [#allocation2]   ;;  %s127_s16 = scalar_lea.hbm %s231_s0, 256 }
   0x2   :  { %s15_s13 = sshll.u32 %s175_s12, 4  ;;  %p128_p0 = scmp.ne.s32.totalorder %s231_s0, %s127_s16  ;;  %s16_s13 = int_to_ptr.vmem [resolvable:$true] %s15_s13 }
   0x3   :  { %p131_p1 = scmp.lt.u32.totalorder %s127_s16, %s231_s0 }
   0x5   :  { %p133_p2 = pnand %p131_p1, %p128_p0 }
   0x7   :  { %136 = shalt.err (!%p133_p2)
}
   0x8   :  { %s137_s21 = scalar_lea.vmem %s16_s13, 256  ;;  %p142_p4 = scmp.lt.s32.totalorder %s16_s13, %s16_s13 }
   0x9   :  { %p138_p3 = scmp.ne.s32.totalorder %s16_s13, %s137_s21  ;;  %p143_p5 = scmp.lt.s32.totalorder %s137_s21, %s137_s21 }
   0xb   :  { %p144_p6 = por %p143_p5, %p142_p4 }
   0xd   :  { %p145_p7 = pnand %p144_p6, %p138_p3 }
   0xf   :  { %148 = shalt.err (!%p145_p7)
}
  0x10   :  { %s176_s22 = smov 128   ;;  %s177_s23 = smov 8  }
  0x11   :  { %21 = dma.hbm_to_vmem [thread:$0]  %s231_s0, 256, %s16_s13, [#allocation3], %s176_s22, %s176_s22, %s177_s23  }
  0x12   :  { %171 = dma.done.wait [#allocation3], 256  }
  0x13   :  { %172 = vsyncadd [#allocation3], 4294967040  ;;  %vm31_vm0 = vcmask 261120   ;;  %v29_v0 = vld [vmem:[#allocation2] sm:$0xff]  ;;  %v30_v1 = vld [vmem:[#allocation2 + $0x8] sm:$0xff]  ;;  %vm91_vm1 = vcmask 257024  }
  0x14   :  { %v32_v2 = vsel %vm31_vm0, %v29_v0, 0.0  ;;  %v41_v3 = vmul.f32 %v29_v0, %v29_v0  ;;  %v42_v4 = vmul.f32 %v30_v1, %v30_v1  ;;  %v35_v6 = vsel %vm31_vm0, %v30_v1, 0.0  ;;  %v111_v26 = vld [vmem:[%s232_s1] ss:$0 sm:$0xff]  ;;  %s178_s29 = smov [#allocation5]  }
  0x15   :  { %33 = vadd.xlane.f32.xlu0 %v32_v2  ;;  %v112_v28 = vld [vmem:[%s233_s2] ss:$0 sm:$0xff]  ;;  %s99_s30 = sshll.u32 %s178_s29, 4  ;;  %s100_s30 = int_to_ptr.vmem [resolvable:$true] %s99_s30 }
  0x16   :  { %v43_v5 = vsel %vm31_vm0, %v41_v3, 0.0  ;;  %v46_v7 = vsel %vm31_vm0, %v42_v4, 0.0  ;;  %s149_s1 = scalar_lea.vmem %s100_s30, 128  ;;  %p154_p9 = scmp.lt.s32.totalorder %s100_s30, %s100_s30 }
  0x17   :  { %44 = vadd.xlane.f32.xlu1 %v43_v5  ;;  %p150_p8 = scmp.ne.s32.totalorder %s100_s30, %s149_s1  ;;  %p155_p10 = scmp.lt.s32.totalorder %s149_s1, %s149_s1 }
  0x19   :  { %36 = vadd.xlane.f32.xlu0 %v35_v6  ;;  %p156_p11 = por %p155_p10, %p154_p9 }
  0x1b   :  { %47 = vadd.xlane.f32.xlu1 %v46_v7  ;;  %p157_p12 = pnand %p156_p11, %p150_p8 }
  0xa2   :  { %v34_v8 = vpop.xlane.xlu0 %33 }
  0xa3   :  { %v39_v9 = vmul.f32 0.03125, %v34_v8 }
  0xa4   :  { %v45_v10 = vpop.xlane.xlu1 %44 }
  0xa5   :  { %v51_v11 = vmul.f32 %v39_v9, %v39_v9  ;;  %v49_v12 = vmul.f32 0.03125, %v45_v10  ;;  %v57_v24 = vsub.f32 %v29_v0, %v39_v9 }
  0xa6   :  { %v37_v13 = vpop.xlane.xlu0 %36 }
  0xa7   :  { %v53_v14 = vsub.f32 %v49_v12, %v51_v11  ;;  %v40_v15 = vmul.f32 0.03125, %v37_v13 }
  0xa8   :  { %v48_v16 = vpop.xlane.xlu1 %47 }
  0xa9   :  { %v55_v17 = vmax.f32 %v53_v14, 0.0  ;;  %v52_v18 = vmul.f32 %v40_v15, %v40_v15  ;;  %v50_v19 = vmul.f32 0.03125, %v48_v16  ;;  %v58_v29 = vsub.f32 %v30_v1, %v40_v15 }
  0xab   :  { %v59_v20 = vadd.f32 1e-12, %v55_v17  ;;  %v54_v21 = vsub.f32 %v50_v19, %v52_v18 }
  0xad   :  { %123 = vrsqrt.f32 %v59_v20  ;;  %v56_v22 = vmax.f32 %v54_v21, 0.0 }
  0xaf   :  { %v60_v23 = vadd.f32 1e-12, %v56_v22 }
  0xb1   :  { %125 = vrsqrt.f32 %v60_v23 }
  0xb7   :  { %v124_v25 = vpop.eup %123 }
  0xb8   :  { %v63_v27 = vmul.f32 %v124_v25, %v57_v24 }
  0xba   :  { %v72_v30 = vmul.f32 %v111_v26, %v63_v27 }
  0xbb   :  { %v126_v31 = vpop.eup %125 }
  0xbc   :  { %v64_v32 = vmul.f32 %v126_v31, %v58_v29  ;;  %v81_v33 = vadd.f32 %v112_v28, %v72_v30 }
  0xbe   :  { %v73_v34 = vmul.f32 %v111_v26, %v64_v32  ;;  %v115_v35 = vpack.c.bf16 %v81_v33, %v81_v33 }
  0xc0   :  { %v82_v36 = vadd.f32 %v112_v28, %v73_v34  ;;  %92 = vst.msk [vmem:[#allocation5] sm:$0xf] %vm91_vm1, %v115_v35 }
  0xc2   :  { %v116_v37 = vpack.c.bf16 %v82_v36, %v82_v36 }
  0xc4   :  { %93 = vst.msk [vmem:[#allocation5 + $0x4] sm:$0xf] %vm91_vm1, %v116_v37 }
  0xc5   :  { %160 = shalt.err (!%p157_p12)
}
  0xc6   :  { %s161_s5 = scalar_lea.hbm %s234_s3, 128 }
  0xc7   :  { %p162_p13 = scmp.ne.s32.totalorder %s234_s3, %s161_s5  ;;  %p165_p0 = scmp.lt.u32.totalorder %s161_s5, %s234_s3 }
  0xc9   :  { %p167_p1 = pnand %p165_p0, %p162_p13 }
  0xcb   :  { %170 = shalt.err (!%p167_p1)
}
  0xcc   :  { %s179_s10 = smov 64   ;;  %s180_s11 = smov 4  }
  0xcd   :  { %105 = dma.vmem_to_hbm [thread:$0]  %s100_s30, 128, %s234_s3, [#allocation4], %s179_s10, %s179_s10, %s180_s11  }
  0xce   :  { %173 = dma.done.wait [#allocation4], 128  }
  0xcf   :  { %174 = vsyncadd [#allocation4], 4294967168 }
  0xd0   :  { %109 = vsyncpa [#allocation3], 1 }
  0xd1   :  { %110 = vsyncpa [#allocation4], 1 }

</bundles_post_ra>
